<compile_context>
chip_gen: v5e
topology: v5e:2x2
jax: 0.10.0
libtpu: 0.0.40
codegen_flags: <defaults>
</compile_context>

<pallas_src>
import math
import jax
import jax.numpy as jnp
from jax.experimental import pallas as pl
from jax.experimental.pallas import tpu as pltpu

_HP = 128           # lane-padded feature width (state / hidden / action all padded to 128)
_NUM_LAYERS = 5


def _mlp_kernel(x_ref, w_ref, b_ref, o_ref):
    # x_ref: (TB, 128) f32 batch tile
    # w_ref: (5, 128, 128) bf16 weight slab, VMEM-resident across all grid steps
    # b_ref: (5, 128) f32 bias slab, VMEM-resident
    # o_ref: (TB, 128) f32 lane-dense output tile (padded cols are exactly zero)
    b_all = b_ref[...]                      # (5, 128) f32
    h = x_ref[...]                          # (TB, 128) f32
    wd = w_ref.dtype
    for i in range(_NUM_LAYERS - 1):
        z = jnp.dot(h.astype(wd), w_ref[i], preferred_element_type=jnp.float32)
        h = jnp.maximum(z + b_all[i:i + 1, :], 0.0)          # bias-add / ReLU in f32
    out = jnp.dot(h.astype(wd), w_ref[_NUM_LAYERS - 1],
                  preferred_element_type=jnp.float32) + b_all[_NUM_LAYERS - 1:, :]
    o_ref[...] = out.astype(o_ref.dtype)


def conv_q_network_forward(x, packed, *, tile_batch=256):
    """x: (batch, state_size) f32. packed: output of pack_params()."""
    w_pack, b_pack = packed["w"], packed["b"]
    state_size = packed["state_size"]
    action_size = packed["action_size"]
    batch = x.shape[0]
    assert x.shape[1] == state_size

    # Batch tile: >=256 rows when possible so the MXU sees a real M dimension;
    # otherwise round the whole batch up to a sublane multiple (single grid step).
    if batch >= tile_batch:
        tb = tile_batch
    else:
        tb = max(8, -(-batch // 8) * 8)
    padded_batch = -(-batch // tb) * tb

    # Zero-pad batch and feature dims. Padded weight rows/cols and bias lanes are zero,
    # so the padded computation is numerically identical to the unpadded one.
    x_p = jnp.zeros((padded_batch, _HP), jnp.float32).at[:batch, :state_size].set(x)

    grid = (padded_batch // tb,)
    flops = 2 * padded_batch * _NUM_LAYERS * _HP * _HP
    bytes_accessed = (x_p.size * 4
                      + w_pack.size * w_pack.dtype.itemsize
                      + b_pack.size * 4
                      + padded_batch * _HP * 4)

    out_p = pl.pallas_call(
        _mlp_kernel,
        out_shape=jax.ShapeDtypeStruct((padded_batch, _HP), jnp.float32),
        grid_spec=pltpu.PrefetchScalarGridSpec(
            num_scalar_prefetch=0,
            grid=grid,
            in_specs=[
                pl.BlockSpec((tb, _HP), lambda i: (i, 0)),                   # x: tiled over batch
                pl.BlockSpec((_NUM_LAYERS, _HP, _HP), lambda i: (0, 0, 0)),  # weights: resident
                pl.BlockSpec((_NUM_LAYERS, _HP), lambda i: (0, 0)),          # biases: resident
            ],
            out_specs=pl.BlockSpec((tb, _HP), lambda i: (i, 0)),
        ),
        compiler_params=pltpu.CompilerParams(
            dimension_semantics=("parallel",)),
        cost_estimate=pl.CostEstimate(
            flops=flops, transcendentals=0, bytes_accessed=bytes_accessed),
    )(x_p, w_pack, b_pack)

    return out_p[:batch, :action_size]


# ---------------------------------------------------------------------------
# Parameter construction (matches PyTorch: xavier_uniform_ weights, default bias init)
# ---------------------------------------------------------------------------

def _xavier_uniform(key, fan_in, fan_out, dtype=jnp.float32):
    a = math.sqrt(6.0 / (fan_in + fan_out))
    return jax.random.uniform(key, (fan_in, fan_out), dtype=dtype, minval=-a, maxval=a)


def _linear_bias(key, fan_in, fan_out, dtype=jnp.float32):
    bound = 1.0 / math.sqrt(fan_in)
    return jax.random.uniform(key, (fan_out,), dtype=dtype, minval=-bound, maxval=bound)


def init_params(key, state_size, action_size, hidden=64):
    dims = [(state_size, hidden), (hidden, hidden), (hidden, hidden),
            (hidden, hidden), (hidden, action_size)]
    params = {}
    for i, (fi, fo) in enumerate(dims, start=1):
        key, kw, kb = jax.random.split(key, 3)
        params[f"w{i}"] = _xavier_uniform(kw, fi, fo)   # (in, out) = PyTorch weight.T
        params[f"b{i}"] = _linear_bias(kb, fi, fo)      # (out,)
    return params


def pack_params(params, *, weight_dtype=jnp.bfloat16):
    """Pack the 5 (in,out) weights into a zero-padded (5,128,128) slab (bf16 for the MXU)
    and the 5 biases into a zero-padded (5,128) f32 slab."""
    w_pack = jnp.zeros((_NUM_LAYERS, _HP, _HP), dtype=weight_dtype)
    b_pack = jnp.zeros((_NUM_LAYERS, _HP), dtype=jnp.float32)
    for i in range(_NUM_LAYERS):
        w = params[f"w{i + 1}"]
        b = params[f"b{i + 1}"].reshape(-1)
        fi, fo = w.shape
        w_pack = w_pack.at[i, :fi, :fo].set(w.astype(weight_dtype))
        b_pack = b_pack.at[i, :fo].set(b.astype(jnp.float32))
    return {"w": w_pack, "b": b_pack,
            "state_size": int(params["w1"].shape[0]),
            "action_size": int(params["w5"].shape[1])}


if __name__ == "__main__":
    state_size = 16
    action_size = 4
    batch = 8

    key = jax.random.PRNGKey(0)
    key, kx = jax.random.split(key)
    x = jax.random.normal(kx, (batch, state_size), dtype=jnp.float32)
    params = init_params(key, state_size, action_size)
    packed = pack_params(params)

    out = conv_q_network_forward(x, packed)
    out = jax.block_until_ready(out)
    assert out.shape == (batch, action_size)

    # Pure-JAX reference with the same mixed precision as the kernel
    # (bf16 MXU inputs, f32 accumulation, f32 bias-add / ReLU).
    wd = jnp.bfloat16
    h = x
    for i in range(1, _NUM_LAYERS):
        z = jnp.dot(h.astype(wd), params[f"w{i}"].astype(wd),
                    preferred_element_type=jnp.float32) + params[f"b{i}"]
        h = jnp.maximum(z, 0.0)
    ref = jnp.dot(h.astype(wd), params[f"w{_NUM_LAYERS}"].astype(wd),
                  preferred_element_type=jnp.float32) + params[f"b{_NUM_LAYERS}"]

    assert jnp.allclose(out, ref, atol=1e-3, rtol=1e-3), (
        f"max abs err {float(jnp.max(jnp.abs(out - ref)))}")

    print("KERNEL_OK")
</pallas_src>

<mosaic_0001>
module attributes {stable_mosaic.version = 11 : i64} {
  func.func @_mlp_kernel(%arg0: i32, %arg1: memref<8x128xf32, #tpu.memory_space<vmem>>, %arg2: memref<5x128x128xbf16, #tpu.memory_space<vmem>>, %arg3: memref<5x128xf32, #tpu.memory_space<vmem>>, %arg4: memref<8x128xf32, #tpu.memory_space<vmem>>) attributes {dimension_semantics = [#tpu.dimension_semantics<parallel>], iteration_bounds = array<i64: 1>, scalar_prefetch = 0 : i64, scratch_operands = 0 : i64, tpu.core_type = #tpu.core_type<tc>, window_params = [{transform_indices = @transform_0, window_bounds = array<i64: 8, 128>}, {pipeline_mode = #tpu.pipeline_mode<synchronous>, transform_indices = @transform_1, window_bounds = array<i64: 5, 128, 128>}, {pipeline_mode = #tpu.pipeline_mode<synchronous>, transform_indices = @transform_2, window_bounds = array<i64: 5, 128>}, {transform_indices = @transform_3, window_bounds = array<i64: 8, 128>}]} {
    %c0 = arith.constant 0 : index
    %c0_0 = arith.constant 0 : index
    %0 = vector.load %arg3[%c0, %c0_0] : memref<5x128xf32, #tpu.memory_space<vmem>>, vector<5x128xf32>
    %c0_1 = arith.constant 0 : index
    %c0_2 = arith.constant 0 : index
    %1 = vector.load %arg1[%c0_1, %c0_2] : memref<8x128xf32, #tpu.memory_space<vmem>>, vector<8x128xf32>
    %2 = arith.truncf %1 : vector<8x128xf32> to vector<8x128xbf16>
    %c0_3 = arith.constant 0 : index
    %c0_4 = arith.constant 0 : index
    %c0_5 = arith.constant 0 : index
    %3 = vector.load %arg2[%c0_3, %c0_4, %c0_5] : memref<5x128x128xbf16, #tpu.memory_space<vmem>>, vector<1x128x128xbf16>
    %4 = vector.shape_cast %3 : vector<1x128x128xbf16> to vector<128x128xbf16>
    %cst = arith.constant dense<0.000000e+00> : vector<8x128xf32>
    %5 = tpu.matmul %2, %4, %cst {dimension_numbers = #tpu.dot_dimension_numbers<[1], [0], [0], [1], [0, 0, 1, 1], [], []>} : vector<8x128xbf16>, vector<128x128xbf16>, vector<8x128xf32> -> vector<8x128xf32>
    %6 = vector.extract_strided_slice %0 {offsets = [0, 0], sizes = [1, 128], strides = [1, 1]} : vector<5x128xf32> to vector<1x128xf32>
    %7 = vector.broadcast %6 : vector<1x128xf32> to vector<8x128xf32>
    %8 = arith.addf %5, %7 : vector<8x128xf32>
    %cst_6 = arith.constant 0.000000e+00 : f32
    %9 = vector.broadcast %cst_6 : f32 to vector<8x128xf32>
    %10 = arith.maximumf %8, %9 : vector<8x128xf32>
    %11 = arith.truncf %10 : vector<8x128xf32> to vector<8x128xbf16>
    %c1 = arith.constant 1 : index
    %c0_7 = arith.constant 0 : index
    %c0_8 = arith.constant 0 : index
    %12 = vector.load %arg2[%c1, %c0_7, %c0_8] : memref<5x128x128xbf16, #tpu.memory_space<vmem>>, vector<1x128x128xbf16>
    %13 = vector.shape_cast %12 : vector<1x128x128xbf16> to vector<128x128xbf16>
    %cst_9 = arith.constant dense<0.000000e+00> : vector<8x128xf32>
    %14 = tpu.matmul %11, %13, %cst_9 {dimension_numbers = #tpu.dot_dimension_numbers<[1], [0], [0], [1], [0, 0, 1, 1], [], []>} : vector<8x128xbf16>, vector<128x128xbf16>, vector<8x128xf32> -> vector<8x128xf32>
    %15 = vector.extract_strided_slice %0 {offsets = [1, 0], sizes = [1, 128], strides = [1, 1]} : vector<5x128xf32> to vector<1x128xf32>
    %16 = vector.broadcast %15 : vector<1x128xf32> to vector<8x128xf32>
    %17 = arith.addf %14, %16 : vector<8x128xf32>
    %cst_10 = arith.constant 0.000000e+00 : f32
    %18 = vector.broadcast %cst_10 : f32 to vector<8x128xf32>
    %19 = arith.maximumf %17, %18 : vector<8x128xf32>
    %20 = arith.truncf %19 : vector<8x128xf32> to vector<8x128xbf16>
    %c2 = arith.constant 2 : index
    %c0_11 = arith.constant 0 : index
    %c0_12 = arith.constant 0 : index
    %21 = vector.load %arg2[%c2, %c0_11, %c0_12] : memref<5x128x128xbf16, #tpu.memory_space<vmem>>, vector<1x128x128xbf16>
    %22 = vector.shape_cast %21 : vector<1x128x128xbf16> to vector<128x128xbf16>
    %cst_13 = arith.constant dense<0.000000e+00> : vector<8x128xf32>
    %23 = tpu.matmul %20, %22, %cst_13 {dimension_numbers = #tpu.dot_dimension_numbers<[1], [0], [0], [1], [0, 0, 1, 1], [], []>} : vector<8x128xbf16>, vector<128x128xbf16>, vector<8x128xf32> -> vector<8x128xf32>
    %24 = vector.extract_strided_slice %0 {offsets = [2, 0], sizes = [1, 128], strides = [1, 1]} : vector<5x128xf32> to vector<1x128xf32>
    %25 = vector.broadcast %24 : vector<1x128xf32> to vector<8x128xf32>
    %26 = arith.addf %23, %25 : vector<8x128xf32>
    %cst_14 = arith.constant 0.000000e+00 : f32
    %27 = vector.broadcast %cst_14 : f32 to vector<8x128xf32>
    %28 = arith.maximumf %26, %27 : vector<8x128xf32>
    %29 = arith.truncf %28 : vector<8x128xf32> to vector<8x128xbf16>
    %c3 = arith.constant 3 : index
    %c0_15 = arith.constant 0 : index
    %c0_16 = arith.constant 0 : index
    %30 = vector.load %arg2[%c3, %c0_15, %c0_16] : memref<5x128x128xbf16, #tpu.memory_space<vmem>>, vector<1x128x128xbf16>
    %31 = vector.shape_cast %30 : vector<1x128x128xbf16> to vector<128x128xbf16>
    %cst_17 = arith.constant dense<0.000000e+00> : vector<8x128xf32>
    %32 = tpu.matmul %29, %31, %cst_17 {dimension_numbers = #tpu.dot_dimension_numbers<[1], [0], [0], [1], [0, 0, 1, 1], [], []>} : vector<8x128xbf16>, vector<128x128xbf16>, vector<8x128xf32> -> vector<8x128xf32>
    %33 = vector.extract_strided_slice %0 {offsets = [3, 0], sizes = [1, 128], strides = [1, 1]} : vector<5x128xf32> to vector<1x128xf32>
    %34 = vector.broadcast %33 : vector<1x128xf32> to vector<8x128xf32>
    %35 = arith.addf %32, %34 : vector<8x128xf32>
    %cst_18 = arith.constant 0.000000e+00 : f32
    %36 = vector.broadcast %cst_18 : f32 to vector<8x128xf32>
    %37 = arith.maximumf %35, %36 : vector<8x128xf32>
    %38 = arith.truncf %37 : vector<8x128xf32> to vector<8x128xbf16>
    %c4 = arith.constant 4 : index
    %c0_19 = arith.constant 0 : index
    %c0_20 = arith.constant 0 : index
    %39 = vector.load %arg2[%c4, %c0_19, %c0_20] : memref<5x128x128xbf16, #tpu.memory_space<vmem>>, vector<1x128x128xbf16>
    %40 = vector.shape_cast %39 : vector<1x128x128xbf16> to vector<128x128xbf16>
    %cst_21 = arith.constant dense<0.000000e+00> : vector<8x128xf32>
    %41 = tpu.matmul %38, %40, %cst_21 {dimension_numbers = #tpu.dot_dimension_numbers<[1], [0], [0], [1], [0, 0, 1, 1], [], []>} : vector<8x128xbf16>, vector<128x128xbf16>, vector<8x128xf32> -> vector<8x128xf32>
    %42 = vector.extract_strided_slice %0 {offsets = [4, 0], sizes = [1, 128], strides = [1, 1]} : vector<5x128xf32> to vector<1x128xf32>
    %43 = vector.broadcast %42 : vector<1x128xf32> to vector<8x128xf32>
    %44 = arith.addf %41, %43 : vector<8x128xf32>
    %c0_22 = arith.constant 0 : index
    %c0_23 = arith.constant 0 : index
    %45 = vector.load %arg4[%c0_22, %c0_23] : memref<8x128xf32, #tpu.memory_space<vmem>>, vector<8x128xf32>
    tpu.vector_store %arg4[%c0_22, %c0_23], %44 {strides = array<i32>} : memref<8x128xf32, #tpu.memory_space<vmem>>, vector<8x128xf32>,
    return
  }
  func.func @transform_0(%arg0: i32) -> (i32, i32) {
    %c0_i32 = arith.constant 0 : i32
    %c0_i32_0 = arith.constant 0 : i32
    return %arg0, %c0_i32 : i32, i32
  }
  func.func @transform_1(%arg0: i32) -> (i32, i32, i32) {
    %c0_i32 = arith.constant 0 : i32
    %c0_i32_0 = arith.constant 0 : i32
    %c0_i32_1 = arith.constant 0 : i32
    %c0_i32_2 = arith.constant 0 : i32
    return %c0_i32, %c0_i32_0, %c0_i32_1 : i32, i32, i32
  }
  func.func @transform_2(%arg0: i32) -> (i32, i32) {
    %c0_i32 = arith.constant 0 : i32
    %c0_i32_0 = arith.constant 0 : i32
    %c0_i32_1 = arith.constant 0 : i32
    return %c0_i32, %c0_i32_0 : i32, i32
  }
  func.func @transform_3(%arg0: i32) -> (i32, i32) {
    %c0_i32 = arith.constant 0 : i32
    %c0_i32_0 = arith.constant 0 : i32
    return %arg0, %c0_i32 : i32, i32
  }
}

</mosaic_0001>

<bundles_post_ra>
// kernel: tpu_custom_call.1
= control target key start
LH: loop header
LB: loop body
LE: loop exit
PB: predicated region body
PF: predicated region fallthrough
CT: control target
= control target key end

     0   :  { %8 = vsyncpa [#allocation3], 0  ;;  %s835_s0 = inlined_call_operand.hbm [shape: f32[8,128], index: 0, kind: input, shape index: {}]   ;;  %s836_s1 = inlined_call_operand.hbm [shape: bf16[5,128,128], index: 1, kind: input, shape index: {}]   ;;  %s837_s2 = inlined_call_operand.hbm [shape: f32[5,128], index: 2, kind: input, shape index: {}]   ;;  %s838_s3 = inlined_call_operand.hbm [shape: f32[8,128], index: 3, kind: output, shape index: {}]  }
   0x1   :  { %9 = vsyncpa [#allocation6], 0  ;;  %s26_s14 = sshll.u32 %s836_s1, 4  ;;  %s27_s14 = int_to_ptr.hbm [resolvable:$true] %s26_s14 }
   0x2   :  { %10 = vsyncpa [#allocation4], 0  ;;  %s790_s15 = smov [#allocation5]   ;;  %s16_s19 = sshll.u32 %s835_s0, 4  ;;  %s17_s19 = int_to_ptr.hbm [resolvable:$true] %s16_s19 }
   0x3   :  { %s28_s16 = sshll.u32 %s790_s15, 4  ;;  %s791_s20 = smov 64   ;;  %s29_s16 = int_to_ptr.vmem [resolvable:$true] %s28_s16 }
   0x4   :  { %s792_s21 = smov 4   ;;  %s793_s22 = smov [#allocation2]  }
   0x5   :  { %34 = dma.hbm_to_vmem [thread:$0]  %s27_s14, 5120, %s29_s16, [#allocation6], %s791_s20, %s791_s20, %s792_s21  }
   0x6   :  { %s18_s23 = sshll.u32 %s793_s22, 4  ;;  %s40_s26 = sshll.u32 %s837_s2, 4  ;;  %s19_s23 = int_to_ptr.vmem [resolvable:$true] %s18_s23  ;;  %s41_s26 = int_to_ptr.hbm [resolvable:$true] %s40_s26 }
   0x7   :  { %21 = dma.hbm_to_vmem [thread:$0]  %s17_s19, 128, %s19_s23, [#allocation3]  }
   0x8   :  { %s794_s1 = smov [#allocation7]  }
   0x9   :  { %s42_s27 = sshll.u32 %s794_s1, 4  ;;  %s43_s27 = int_to_ptr.vmem [resolvable:$true] %s42_s27 }
   0xa   :  { %45 = dma.hbm_to_vmem [thread:$0]  %s41_s26, 128, %s43_s27, [#allocation6]  }
   0xb   :  { %784 = dma.done.wait [#allocation3], 128  }
   0xc   :  { %785 = vsyncadd [#allocation3], 4294967168 }
   0xd   :  { %786 = dma.done.wait [#allocation6], 5248  }
   0xe   :  { %787 = vsyncadd [#allocation6], 4294962048  ;;  %v649_v0 = vld [vmem:[#allocation5 + $0x38] sm:$0xff]  ;;  %v648_v1 = vld [vmem:[#allocation5 + $0x30] sm:$0xff]  ;;  %s795_s0 = smov [#allocation8]   ;;  %s471_s30 = sshll.u32 %s838_s3, 4  ;;  %s472_s30 = int_to_ptr.hbm [resolvable:$true] %s471_s30 }
   0xf   :  { %126 = vmatpush.bf16.msra.mxu0 %v649_v0  ;;  %v657_v2 = vld [vmem:[#allocation5 + $0x78] sm:$0xff]  ;;  %v656_v3 = vld [vmem:[#allocation5 + $0x70] sm:$0xff]  ;;  %v647_v4 = vld [vmem:[#allocation5 + $0x28] sm:$0xff]  ;;  %s469_s2 = sshll.u32 %s795_s0, 4  ;;  %s470_s2 = int_to_ptr.vmem [resolvable:$true] %s469_s2 }
  0x10   :  { %207 = vmatpush.bf16.msra.mxu1 %v657_v2  ;;  %v655_v5 = vld [vmem:[#allocation5 + $0x68] sm:$0xff]  ;;  %v646_v6 = vld [vmem:[#allocation5 + $0x20] sm:$0xff]  ;;  %v645_v8 = vld [vmem:[#allocation5 + $0x18] sm:$0xff] }
  0x11   :  { %v654_v7 = vld [vmem:[#allocation5 + $0x60] sm:$0xff]  ;;  %v653_v9 = vld [vmem:[#allocation5 + $0x58] sm:$0xff]  ;;  %v644_v10 = vld [vmem:[#allocation5 + $0x10] sm:$0xff] }
  0x12   :  { %v652_v11 = vld [vmem:[#allocation5 + $0x50] sm:$0xff]  ;;  %v643_v12 = vld [vmem:[#allocation5 + $0x8] sm:$0xff]  ;;  %v642_v13 = vld [vmem:[#allocation5] sm:$0xff] }
  0x13   :  { %127 = vmatpush.bf16.msra.mxu0 %v648_v1  ;;  %v59_v14 = vld [vmem:[#allocation2] sm:$0xff]  ;;  %v651_v16 = vld [vmem:[#allocation5 + $0x48] sm:$0xff]  ;;  %v650_v17 = vld [vmem:[#allocation5 + $0x40] sm:$0xff] }
  0x14   :  { %208 = vmatpush.bf16.msra.mxu1 %v656_v3  ;;  %v60_v15 = vpack.c.bf16 %v59_v14, %v59_v14  ;;  %v665_v18 = vld [vmem:[#allocation5 + $0xb8] sm:$0xff]  ;;  %v664_v19 = vld [vmem:[#allocation5 + $0xb0] sm:$0xff]  ;;  %v663_v20 = vld [vmem:[#allocation5 + $0xa8] sm:$0xff] }
  0x15   :  { %288 = vmatpush.bf16.msra.mxu2 %v665_v18  ;;  %v662_v21 = vld [vmem:[#allocation5 + $0xa0] sm:$0xff]  ;;  %v661_v22 = vld [vmem:[#allocation5 + $0x98] sm:$0xff]  ;;  %v660_v24 = vld [vmem:[#allocation5 + $0x90] sm:$0xff] }
  0x16   :  { %v825_v23 = vld [vmem:[#allocation7] sm:$0x1f]  ;;  %v659_v31 = vld [vmem:[#allocation5 + $0x88] sm:$0xff]  ;;  %v673_v33 = vld [vmem:[#allocation5 + $0xf8] sm:$0xff] }
  0x17   :  { %128 = vmatpush.bf16.msra.mxu0 %v647_v4  ;;  %v77_v25 = vperm.slane %v825_v23, 0  ;;  %v658_v32 = vld [vmem:[#allocation5 + $0x80] sm:$0xff]  ;;  %369 = vmatpush.bf16.msra.mxu3 %v673_v33  ;;  %v672_v34 = vld [vmem:[#allocation5 + $0xf0] sm:$0xff]  ;;  %v671_v35 = vld [vmem:[#allocation5 + $0xe8] sm:$0xff]  ;;  %v158_v39 = vperm.slane %v825_v23, 1  ;;  %v239_v53 = vperm.slane %v825_v23, 2 }
  0x18   :  { %209 = vmatpush.bf16.msra.mxu1 %v655_v5  ;;  %v670_v36 = vld [vmem:[#allocation5 + $0xe0] sm:$0xff]  ;;  %v669_v37 = vld [vmem:[#allocation5 + $0xd8] sm:$0xff]  ;;  %v668_v38 = vld [vmem:[#allocation5 + $0xd0] sm:$0xff]  ;;  %v320_v61 = vperm.slane %v825_v23, 3  ;;  %v401_v3 = vperm.slane %v825_v23, 4 }
  0x19   :  { %289 = vmatpush.bf16.msra.mxu2 %v664_v19  ;;  %v667_v45 = vld [vmem:[#allocation5 + $0xc8] sm:$0xff]  ;;  %v666_v46 = vld [vmem:[#allocation5 + $0xc0] sm:$0xff]  ;;  %v681_v47 = vld [vmem:[#allocation5 + $0x138] sm:$0xff] }
  0x1a   :  { %v680_v48 = vld [vmem:[#allocation5 + $0x130] sm:$0xff]  ;;  %v679_v49 = vld [vmem:[#allocation5 + $0x128] sm:$0xff]  ;;  %v678_v50 = vld [vmem:[#allocation5 + $0x120] sm:$0xff] }
  0x1b   :  { %129 = vmatpush.bf16.msra.mxu0 %v646_v6  ;;  %370 = vmatpush.bf16.msra.mxu3 %v672_v34  ;;  %v677_v51 = vld [vmem:[#allocation5 + $0x118] sm:$0xff]  ;;  %v676_v52 = vld [vmem:[#allocation5 + $0x110] sm:$0xff]  ;;  %v675_v59 = vld [vmem:[#allocation5 + $0x108] sm:$0xff] }
  0x1c   :  { %210 = vmatpush.bf16.msra.mxu1 %v654_v7  ;;  %v674_v60 = vld [vmem:[#allocation5 + $0x100] sm:$0xff] }
  0x1d   :  { %290 = vmatpush.bf16.msra.mxu2 %v663_v20 }
  0x1f   :  { %130 = vmatpush.bf16.msra.mxu0 %v645_v8  ;;  %371 = vmatpush.bf16.msra.mxu3 %v671_v35 }
  0x20   :  { %211 = vmatpush.bf16.msra.mxu1 %v653_v9 }
  0x21   :  { %291 = vmatpush.bf16.msra.mxu2 %v662_v21 }
  0x23   :  { %131 = vmatpush.bf16.msra.mxu0 %v644_v10  ;;  %372 = vmatpush.bf16.msra.mxu3 %v670_v36 }
  0x24   :  { %212 = vmatpush.bf16.msra.mxu1 %v652_v11 }
  0x25   :  { %292 = vmatpush.bf16.msra.mxu2 %v661_v22 }
  0x27   :  { %132 = vmatpush.bf16.msra.mxu0 %v643_v12  ;;  %373 = vmatpush.bf16.msra.mxu3 %v669_v37 }
  0x28   :  { %213 = vmatpush.bf16.msra.mxu1 %v651_v16 }
  0x29   :  { %293 = vmatpush.bf16.msra.mxu2 %v660_v24 }
  0x2b   :  { %133 = vmatpush.bf16.msra.mxu0 %v642_v13  ;;  %374 = vmatpush.bf16.msra.mxu3 %v668_v38 }
  0x2c   :  { %214 = vmatpush.bf16.msra.mxu1 %v650_v17 }
  0x2d   :  { %294 = vmatpush.bf16.msra.mxu2 %v659_v31 }
  0x2e   :  { %134 = vmatmul.bf16.vlgmr.msra.gmra.mxu0 %v60_v15 }
  0x2f   :  { %375 = vmatpush.bf16.msra.mxu3 %v667_v45  ;;  %450 = vmatpush.bf16.msrb.mxu0 %v681_v47 }
  0x31   :  { %295 = vmatpush.bf16.msra.mxu2 %v658_v32 }
  0x33   :  { %376 = vmatpush.bf16.msra.mxu3 %v666_v46  ;;  %451 = vmatpush.bf16.msrb.mxu0 %v680_v48 }
  0x37   :  { %452 = vmatpush.bf16.msrb.mxu0 %v679_v49 }
  0x3b   :  { %453 = vmatpush.bf16.msrb.mxu0 %v678_v50 }
  0x3f   :  { %454 = vmatpush.bf16.msrb.mxu0 %v677_v51 }
  0x43   :  { %455 = vmatpush.bf16.msrb.mxu0 %v676_v52 }
  0x47   :  { %456 = vmatpush.bf16.msrb.mxu0 %v675_v59 }
  0x4b   :  { %457 = vmatpush.bf16.msrb.mxu0 %v674_v60 }
  0xab   :  { %v135_v26 = vpop.f32.mrf.mxu0 }
  0xac   :  { %v136_v27 = vadd.f32 %v135_v26, %v77_v25 }
  0xae   :  { %v139_v28 = vmax.f32 %v136_v27, 0.0 }
  0xb0   :  { %v140_v29 = vpack.c.bf16 %v139_v28, %v139_v28 }
  0xb2   :  { %215 = vmatmul.bf16.vlgmr.msra.gmra.mxu1 %v140_v29 }
  0xb3   :  { %v137_v30 = vpop.f32.mrf.mxu0 }
 0x12f   :  { %v216_v40 = vpop.f32.mrf.mxu1 }
 0x130   :  { %v217_v41 = vadd.f32 %v216_v40, %v158_v39 }
 0x132   :  { %v220_v42 = vmax.f32 %v217_v41, 0.0 }
 0x134   :  { %v221_v43 = vpack.c.bf16 %v220_v42, %v220_v42 }
 0x136   :  { %296 = vmatmul.bf16.vlgmr.msra.gmra.mxu2 %v221_v43 }
 0x137   :  { %v218_v44 = vpop.f32.mrf.mxu1 }
 0x1b9   :  { %v297_v54 = vpop.f32.mrf.mxu2 }
 0x1ba   :  { %v298_v55 = vadd.f32 %v297_v54, %v239_v53 }
 0x1bc   :  { %v301_v56 = vmax.f32 %v298_v55, 0.0 }
 0x1be   :  { %v302_v57 = vpack.c.bf16 %v301_v56, %v301_v56 }
 0x1c0   :  { %377 = vmatmul.bf16.vlgmr.msra.gmra.mxu3 %v302_v57 }
 0x1c1   :  { %v299_v58 = vpop.f32.mrf.mxu2 }
 0x243   :  { %v378_v62 = vpop.f32.mrf.mxu3 }
 0x244   :  { %v379_v63 = vadd.f32 %v378_v62, %v320_v61 }
 0x246   :  { %v382_v0 = vmax.f32 %v379_v63, 0.0 }
 0x248   :  { %v383_v1 = vpack.c.bf16 %v382_v0, %v382_v0 }
 0x24a   :  { %458 = vmatmul.bf16.vlgmr.msrb.gmra.mxu0 %v383_v1 }
 0x24b   :  { %v380_v2 = vpop.f32.mrf.mxu3 }
 0x2c7   :  { %v459_v4 = vpop.f32.mrf.mxu0 }
 0x2c8   :  { %v460_v5 = vadd.f32 %v459_v4, %v401_v3 }
 0x2ca   :  { %463 = vst [vmem:[#allocation8] sm:$0xff] %v460_v5 }
 0x2cb   :  { %474 = dma.vmem_to_hbm [thread:$0]  %s470_s2, 128, %s472_s30, [#allocation4]  }
 0x2cf   :  { %v461_v6 = vpop.f32.mrf.mxu0 }
 0x2d0   :  { %788 = dma.done.wait [#allocation4], 128  }
 0x2d1   :  { %789 = vsyncadd [#allocation4], 4294967168 }
 0x2d2   :  { %479 = vsyncpa [#allocation3], 1 }
 0x2d3   :  { %480 = vsyncpa [#allocation6], 1 }
 0x2d4   :  { %481 = vsyncpa [#allocation4], 1 }

</bundles_post_ra>
